<compile_context>
chip_gen: v7x
topology: tpu7x:2x2x1
jax: 0.10.0
libtpu: 0.0.40
codegen_flags: <defaults>
</compile_context>

<pallas_src>
import functools

import jax
import jax.numpy as jnp
from jax.experimental import pallas as pl
from jax.experimental.pallas import tpu as pltpu

_LANE = 128
_HEADROOM = 4 << 20


def _round_up(x, m):
    return ((x + m - 1) // m) * m


def _vmem_budget():
    """Generation-aware per-core VMEM budget (bytes)."""
    cap = 64 << 20  # v7x-safe fallback (per-TensorCore)
    try:
        info = pltpu.get_tpu_info()
        c = getattr(info, "vmem_capacity_bytes", None)
        if c:
            cap = int(c)
    except Exception:
        pass
    cap = min(cap, 128 << 20)
    return max(32 << 20, (cap * 3) // 4)   # ~48 MiB on v7x, ~96 MiB on v5e/v6e


# --------------------------------------------------------------------------
# Kernels
# --------------------------------------------------------------------------
def _proj_kernel(x_ref, w_ref, out_ref, *, compute_dtype):
    """support tile = x_tile @ W  (Dp is 128-aligned -> MXU fully fed)."""
    x = x_ref[...].astype(compute_dtype)
    w = w_ref[...].astype(compute_dtype)
    out_ref[...] = jnp.dot(
        x, w, preferred_element_type=jnp.float32
    ).astype(out_ref.dtype)


def _agg_kernel(adj_ref, adjw_ref, sup_ref, out_ref, acc_ref, *, compute_dtype):
    """acc += (adj + adj_w)_tile @ support_tile; L2-normalize rows at last k."""
    k = pl.program_id(1)

    @pl.when(k == 0)
    def _():
        acc_ref[...] = jnp.zeros_like(acc_ref)

    # VPU casts (hide under DMA); on v7x the MXU has no int path so int8 adj
    # is widened to bf16/f32 before the dot.
    a = adj_ref[...].astype(compute_dtype) + adjw_ref[...].astype(compute_dtype)
    s = sup_ref[...].astype(compute_dtype)
    acc_ref[...] += jnp.dot(a, s, preferred_element_type=jnp.float32)

    @pl.when(k == pl.num_programs(1) - 1)
    def _():
        acc = acc_ref[...]
        # F.normalize(., p=2, dim=-1): x / max(||x||, 1e-12)
        # == x * rsqrt(max(||x||^2, 1e-24)); rsqrt uses the EUP slot.
        sq = jnp.sum(acc * acc, axis=-1, keepdims=True)
        inv = jax.lax.rsqrt(jnp.maximum(sq, 1e-24))
        out_ref[...] = (acc * inv).astype(out_ref.dtype)


# --------------------------------------------------------------------------
# Tile selection
# --------------------------------------------------------------------------
def _pick_agg_tiles(N, Dp, adj_item, adjw_item, sup_item, budget):
    """Largest (tm, tk) whose double-buffered working set fits the budget."""
    n128 = _round_up(max(N, 1), _LANE)
    # Sublane multiple for packed adjacency dtypes (int8 -> 32, bf16 -> 16).
    sub_mult = max(8, 32 // min(adj_item, adjw_item))
    tk_cands = [t for t in (512, 256, 128) if t <= n128] or [128]
    tm_cands = [t for t in (512, 256, 128, 64, 32, 16, 8)
                if t <= n128 and t % sub_mult == 0] or [sub_mult]
    for tm in tm_cands:
        for tk in tk_cands:
            need = (2 * tm * tk * (adj_item + adjw_item)   # adj + adj_w tiles
                    + 2 * tk * Dp * sup_item               # support K tile
                    + 2 * tm * Dp * 4                      # output tile
                    + tm * Dp * 4)                         # f32 accumulator
            if need + _HEADROOM <= budget:
                return tm, tk
    return tm_cands[-1], tk_cands[-1]


def _pick_proj_tm(Np, Dp, sup_item, budget):
    """Projection row tile, independent of the aggregation tile."""
    for t in (1024, 512, 256, 128, 64, 32, 16, 8):
        if Np % t:
            continue
        need = 2 * t * Dp * 4 + 2 * Dp * Dp * 4 + 2 * t * Dp * sup_item
        if need + _HEADROOM <= budget:
            return t
    return 8


# --------------------------------------------------------------------------
# Forward
# --------------------------------------------------------------------------
@functools.partial(jax.jit, static_argnames=("compute_dtype",))
def gcn_forward(x, weight, adj, adj_w, *, compute_dtype=jnp.float32):
    N, D = x.shape
    assert weight.shape == (D, D)
    assert adj.shape == (N, N) and adj_w.shape == (N, N)

    budget = _vmem_budget()
    sup_item = jnp.dtype(compute_dtype).itemsize
    adj_item = jnp.dtype(adj.dtype).itemsize
    adjw_item = jnp.dtype(adj_w.dtype).itemsize

    # Pad feature dim to a multiple of 128: lane-dense stores, full MXU width.
    Dp = max(_LANE, _round_up(D, _LANE))

    tm, tk = _pick_agg_tiles(N, Dp, adj_item, adjw_item, sup_item, budget)
    # Zero-pad N up to a multiple of both tiles (tm, tk are powers of two, so
    # max(tm, tk) is a common multiple).  Zero rows/cols contribute nothing.
    Np = _round_up(N, max(tm, tk))

    x_p = jnp.pad(x, ((0, Np - N), (0, Dp - D))) if (Np != N or Dp != D) else x
    w_p = jnp.pad(weight, ((0, Dp - D), (0, Dp - D))) if Dp != D else weight
    if Np != N:
        adj_p = jnp.pad(adj, ((0, Np - N), (0, Np - N)))
        adjw_p = jnp.pad(adj_w, ((0, Np - N), (0, Np - N)))
    else:
        adj_p, adjw_p = adj, adj_w

    # ---- projection: support = x @ W  (computed exactly once) ----
    tmp = _pick_proj_tm(Np, Dp, sup_item, budget)
    support = pl.pallas_call(
        functools.partial(_proj_kernel, compute_dtype=compute_dtype),
        out_shape=jax.ShapeDtypeStruct((Np, Dp), compute_dtype),
        grid=(Np // tmp,),
        in_specs=[
            pl.BlockSpec((tmp, Dp), lambda i: (i, 0)),   # x row tile
            pl.BlockSpec((Dp, Dp), lambda i: (0, 0)),    # full weight
        ],
        out_specs=pl.BlockSpec((tmp, Dp), lambda i: (i, 0)),
        compiler_params=pltpu.CompilerParams(
            dimension_semantics=("parallel",),
            vmem_limit_bytes=int(budget),
        ),
    )(x_p, w_p)

    # ---- aggregation (K-tiled) + row-wise L2 normalize ----
    out_p = pl.pallas_call(
        functools.partial(_agg_kernel, compute_dtype=compute_dtype),
        out_shape=jax.ShapeDtypeStruct((Np, Dp), jnp.float32),
        grid=(Np // tm, Np // tk),                        # rows parallel, K last
        in_specs=[
            pl.BlockSpec((tm, tk), lambda i, k: (i, k)),  # adj row/col tile
            pl.BlockSpec((tm, tk), lambda i, k: (i, k)),  # adj_w row/col tile
            pl.BlockSpec((tk, Dp), lambda i, k: (k, 0)),  # support K tile
        ],
        out_specs=pl.BlockSpec((tm, Dp), lambda i, k: (i, 0)),
        scratch_shapes=[pltpu.VMEM((tm, Dp), jnp.float32)],
        compiler_params=pltpu.CompilerParams(
            dimension_semantics=("parallel", "arbitrary"),
            vmem_limit_bytes=int(budget),
        ),
    )(adj_p, adjw_p, support)

    # Drop padded rows / zero-padded feature columns (zero-contribution).
    return out_p[:N, :D]


def _reference(x, weight, adj, adj_w):
    a = adj + adj_w
    support = x @ weight
    out = a @ support
    norm = jnp.maximum(jnp.linalg.norm(out, axis=-1, keepdims=True), 1e-12)
    return out / norm


if __name__ == "__main__":
    N, D = 128, 64  # num_nodes, embed_dim
    key = jax.random.PRNGKey(0)
    kx, kw, ka, kaw = jax.random.split(key, 4)

    # Node features
    x = jax.random.normal(kx, (N, D), dtype=jnp.float32)

    # Xavier-uniform init of weight [D, D] (deterministic)
    bound = (6.0 / (D + D)) ** 0.5
    weight = jax.random.uniform(kw, (D, D), minval=-bound, maxval=bound,
                                dtype=jnp.float32)

    # Dense (sparse-in-pytorch) adjacency and its learned weights
    adj = (jax.random.uniform(ka, (N, N)) < 0.1).astype(jnp.float32)
    adj_w = jax.random.uniform(kaw, (N, N), dtype=jnp.float32) * 0.1

    ref = _reference(x, weight, adj, adj_w)

    # f32 path: matches PyTorch semantics bit-for-bit-ish.
    out = jax.block_until_ready(gcn_forward(x, weight, adj, adj_w))
    assert out.shape == (N, D)
    assert jnp.allclose(out, ref, atol=1e-5, rtol=1e-5), (
        float(jnp.max(jnp.abs(out - ref))))

    # Bandwidth-optimized path: int8 adjacency mask + bf16 edge weights,
    # bf16 MXU operands with f32 accumulation (v6e / v7x fast path, ~8->3 B/elem
    # on the HBM-bound adjacency stream).  Relaxed tolerance (bf16 operands).
    out_fast = jax.block_until_ready(
        gcn_forward(x, weight, adj.astype(jnp.int8), adj_w.astype(jnp.bfloat16),
                    compute_dtype=jnp.bfloat16))
    assert out_fast.shape == (N, D)
    assert jnp.allclose(out_fast, ref, atol=5e-2, rtol=5e-2), (
        float(jnp.max(jnp.abs(out_fast - ref))))

    print("KERNEL_OK")
</pallas_src>

<mosaic_0001>
module attributes {stable_mosaic.version = 11 : i64} {
  func.func @_proj_kernel(%arg0: i32, %arg1: memref<128x128xf32, #tpu.memory_space<vmem>>, %arg2: memref<128x128xf32, #tpu.memory_space<vmem>>, %arg3: memref<128x128xf32, #tpu.memory_space<vmem>>) attributes {dimension_semantics = [#tpu.dimension_semantics<parallel>], iteration_bounds = array<i64: 1>, scalar_prefetch = 0 : i64, scratch_operands = 0 : i64, tpu.core_type = #tpu.core_type<tc>, window_params = [{transform_indices = @transform_0, window_bounds = array<i64: 128, 128>}, {pipeline_mode = #tpu.pipeline_mode<synchronous>, transform_indices = @transform_1, window_bounds = array<i64: 128, 128>}, {transform_indices = @transform_2, window_bounds = array<i64: 128, 128>}]} {
    %c0 = arith.constant 0 : index
    %c0_0 = arith.constant 0 : index
    %0 = vector.load %arg1[%c0, %c0_0] : memref<128x128xf32, #tpu.memory_space<vmem>>, vector<128x128xf32>
    %c0_1 = arith.constant 0 : index
    %c0_2 = arith.constant 0 : index
    %1 = vector.load %arg2[%c0_1, %c0_2] : memref<128x128xf32, #tpu.memory_space<vmem>>, vector<128x128xf32>
    %cst = arith.constant dense<0.000000e+00> : vector<128x128xf32>
    %2 = tpu.matmul %0, %1, %cst {dimension_numbers = #tpu.dot_dimension_numbers<[1], [0], [0], [1], [0, 0, 1, 1], [], []>} : vector<128x128xf32>, vector<128x128xf32>, vector<128x128xf32> -> vector<128x128xf32>
    %c0_3 = arith.constant 0 : index
    %c0_4 = arith.constant 0 : index
    %3 = vector.load %arg3[%c0_3, %c0_4] : memref<128x128xf32, #tpu.memory_space<vmem>>, vector<128x128xf32>
    tpu.vector_store %arg3[%c0_3, %c0_4], %2 {strides = array<i32>} : memref<128x128xf32, #tpu.memory_space<vmem>>, vector<128x128xf32>,
    return
  }
  func.func @transform_0(%arg0: i32) -> (i32, i32) {
    %c0_i32 = arith.constant 0 : i32
    %c0_i32_0 = arith.constant 0 : i32
    return %arg0, %c0_i32 : i32, i32
  }
  func.func @transform_1(%arg0: i32) -> (i32, i32) {
    %c0_i32 = arith.constant 0 : i32
    %c0_i32_0 = arith.constant 0 : i32
    %c0_i32_1 = arith.constant 0 : i32
    return %c0_i32, %c0_i32_0 : i32, i32
  }
  func.func @transform_2(%arg0: i32) -> (i32, i32) {
    %c0_i32 = arith.constant 0 : i32
    %c0_i32_0 = arith.constant 0 : i32
    return %arg0, %c0_i32 : i32, i32
  }
}

module attributes {stable_mosaic.version = 11 : i64} {
  func.func @_agg_kernel(%arg0: i32, %arg1: i32, %arg2: memref<128x128xf32, #tpu.memory_space<vmem>>, %arg3: memref<128x128xf32, #tpu.memory_space<vmem>>, %arg4: memref<128x128xf32, #tpu.memory_space<vmem>>, %arg5: memref<128x128xf32, #tpu.memory_space<vmem>>, %arg6: memref<128x128xf32, #tpu.memory_space<vmem>>) attributes {dimension_semantics = [#tpu.dimension_semantics<parallel>, #tpu.dimension_semantics<arbitrary>], iteration_bounds = array<i64: 1, 1>, scalar_prefetch = 0 : i64, scratch_operands = 1 : i64, tpu.core_type = #tpu.core_type<tc>, window_params = [{transform_indices = @transform_0, window_bounds = array<i64: 128, 128>}, {transform_indices = @transform_1, window_bounds = array<i64: 128, 128>}, {transform_indices = @transform_2, window_bounds = array<i64: 128, 128>}, {transform_indices = @transform_3, window_bounds = array<i64: 128, 128>}]} {
    %c0_i32 = arith.constant 0 : i32
    %0 = arith.cmpi eq, %arg1, %c0_i32 : i32
    %1 = arith.extui %0 : i1 to i32
    %c0_i32_0 = arith.constant 0 : i32
    %2 = arith.cmpi ne, %1, %c0_i32_0 : i32
    scf.if %2 {
      %cst_12 = arith.constant 0.000000e+00 : f32
      %14 = vector.broadcast %cst_12 : f32 to vector<128x128xf32>
      %c0_13 = arith.constant 0 : index
      %c0_14 = arith.constant 0 : index
      %15 = vector.load %arg6[%c0_13, %c0_14] : memref<128x128xf32, #tpu.memory_space<vmem>>, vector<128x128xf32>
      tpu.vector_store %arg6[%c0_13, %c0_14], %14 {strides = array<i32>} : memref<128x128xf32, #tpu.memory_space<vmem>>, vector<128x128xf32>,
    } else {
    }
    %c0 = arith.constant 0 : index
    %c0_1 = arith.constant 0 : index
    %3 = vector.load %arg2[%c0, %c0_1] : memref<128x128xf32, #tpu.memory_space<vmem>>, vector<128x128xf32>
    %c0_2 = arith.constant 0 : index
    %c0_3 = arith.constant 0 : index
    %4 = vector.load %arg3[%c0_2, %c0_3] : memref<128x128xf32, #tpu.memory_space<vmem>>, vector<128x128xf32>
    %5 = arith.addf %3, %4 : vector<128x128xf32>
    %c0_4 = arith.constant 0 : index
    %c0_5 = arith.constant 0 : index
    %6 = vector.load %arg4[%c0_4, %c0_5] : memref<128x128xf32, #tpu.memory_space<vmem>>, vector<128x128xf32>
    %c0_6 = arith.constant 0 : index
    %c0_7 = arith.constant 0 : index
    %7 = vector.load %arg6[%c0_6, %c0_7] : memref<128x128xf32, #tpu.memory_space<vmem>>, vector<128x128xf32>
    %cst = arith.constant dense<0.000000e+00> : vector<128x128xf32>
    %8 = tpu.matmul %5, %6, %cst {dimension_numbers = #tpu.dot_dimension_numbers<[1], [0], [0], [1], [0, 0, 1, 1], [], []>} : vector<128x128xf32>, vector<128x128xf32>, vector<128x128xf32> -> vector<128x128xf32>
    %9 = arith.addf %7, %8 : vector<128x128xf32>
    %c0_8 = arith.constant 0 : index
    %c0_9 = arith.constant 0 : index
    %10 = vector.load %arg6[%c0_8, %c0_9] : memref<128x128xf32, #tpu.memory_space<vmem>>, vector<128x128xf32>
    tpu.vector_store %arg6[%c0_8, %c0_9], %9 {strides = array<i32>} : memref<128x128xf32, #tpu.memory_space<vmem>>, vector<128x128xf32>,
    %c0_i32_10 = arith.constant 0 : i32
    %11 = arith.cmpi eq, %arg1, %c0_i32_10 : i32
    %12 = arith.extui %11 : i1 to i32
    %c0_i32_11 = arith.constant 0 : i32
    %13 = arith.cmpi ne, %12, %c0_i32_11 : i32
    scf.if %13 {
      %c0_12 = arith.constant 0 : index
      %c0_13 = arith.constant 0 : index
      %14 = vector.load %arg6[%c0_12, %c0_13] : memref<128x128xf32, #tpu.memory_space<vmem>>, vector<128x128xf32>
      %15 = arith.mulf %14, %14 : vector<128x128xf32>
      %cst_14 = arith.constant dense<0.000000e+00> : vector<128xf32>
      %16 = vector.multi_reduction <add>, %15, %cst_14 [1] : vector<128x128xf32> to vector<128xf32>
      %17 = vector.shape_cast %16 : vector<128xf32> to vector<128x1xf32>
      %cst_15 = arith.constant 1.000000e-24 : f32
      %18 = vector.broadcast %cst_15 : f32 to vector<128x1xf32>
      %19 = arith.maximumf %17, %18 : vector<128x1xf32>
      %20 = math.rsqrt %19 : vector<128x1xf32>
      %21 = vector.broadcast %20 : vector<128x1xf32> to vector<128x128xf32>
      %22 = arith.mulf %14, %21 : vector<128x128xf32>
      %c0_16 = arith.constant 0 : index
      %c0_17 = arith.constant 0 : index
      %23 = vector.load %arg5[%c0_16, %c0_17] : memref<128x128xf32, #tpu.memory_space<vmem>>, vector<128x128xf32>
      tpu.vector_store %arg5[%c0_16, %c0_17], %22 {strides = array<i32>} : memref<128x128xf32, #tpu.memory_space<vmem>>, vector<128x128xf32>,
    } else {
    }
    return
  }
  func.func @transform_0(%arg0: i32, %arg1: i32) -> (i32, i32) {
    %c0_i32 = arith.constant 0 : i32
    return %arg0, %arg1 : i32, i32
  }
  func.func @transform_1(%arg0: i32, %arg1: i32) -> (i32, i32) {
    %c0_i32 = arith.constant 0 : i32
    return %arg0, %arg1 : i32, i32
  }
  func.func @transform_2(%arg0: i32, %arg1: i32) -> (i32, i32) {
    %c0_i32 = arith.constant 0 : i32
    %c0_i32_0 = arith.constant 0 : i32
    return %arg1, %c0_i32 : i32, i32
  }
  func.func @transform_3(%arg0: i32, %arg1: i32) -> (i32, i32) {
    %c0_i32 = arith.constant 0 : i32
    %c0_i32_0 = arith.constant 0 : i32
    return %arg0, %c0_i32 : i32, i32
  }
}

</mosaic_0001>

<bundles_post_ra>
// kernel: gcn_forward.2
= control target key start
LH: loop header
LB: loop body
LE: loop exit
PB: predicated region body
PF: predicated region fallthrough
CT: control target
= control target key end

     0   :  { %s503_s1 = inlined_call_operand.vmem [shape: f32[128,128], index: 1, kind: input, shape index: {}]   ;;  %s504_s0 = inlined_call_operand.vmem [shape: f32[128,128], index: 0, kind: input, shape index: {}]   ;;  %s505_s2 = inlined_call_operand.vmem [shape: f32[128,128], index: 2, kind: output, shape index: {}]  }
   0x1   :  { %v27_v0 = vld [vmem:[%s503_s1] sm:$0xff]  ;;  %v28_v1 = vld [vmem:[%s503_s1 + $0x8] sm:$0xff]  ;;  %v29_v2 = vld [vmem:[%s503_s1 + $0x10] sm:$0xff] }
   0x2   :  { %v296_v3 = vpack.c.bf16 %v28_v1, %v27_v0  ;;  %v30_v4 = vld [vmem:[%s503_s1 + $0x18] sm:$0xff]  ;;  %v31_v6 = vld [vmem:[%s503_s1 + $0x20] sm:$0xff]  ;;  %v32_v7 = vld [vmem:[%s503_s1 + $0x28] sm:$0xff] }
   0x3   :  { %v300_v5 = vpack.c.bf16 %v30_v4, %v29_v2  ;;  %v304_v8 = vpack.c.bf16 %v32_v7, %v31_v6  ;;  %v11_v9 = vld [vmem:[%s504_s0] sm:$0xff]  ;;  %v33_v11 = vld [vmem:[%s503_s1 + $0x30] sm:$0xff]  ;;  %v34_v12 = vld [vmem:[%s503_s1 + $0x38] sm:$0xff] }
   0x4   :  { %297 = vmatprep.subr.bf16.mxu0 %v296_v3  ;;  %328 = vmatprep.subr.bf16.mxu1 %v296_v3  ;;  %v19_v10 = vld [vmem:[%s504_s0 + $0x40] sm:$0xff]  ;;  %v308_v13 = vpack.c.bf16 %v34_v12, %v33_v11  ;;  %v36_v15 = vld [vmem:[%s503_s1 + $0x48] sm:$0xff]  ;;  %v37_v17 = vld [vmem:[%s503_s1 + $0x50] sm:$0xff] }
   0x5   :  { %299 = vmatpush3.bf16.msra.mxu0 %v296_v3  ;;  %336 = vmatpush3.bf16.msra.mxu1 %v296_v3  ;;  %v35_v14 = vld [vmem:[%s503_s1 + $0x40] sm:$0xff]  ;;  %v38_v18 = vld [vmem:[%s503_s1 + $0x58] sm:$0xff]  ;;  %v40_v21 = vld [vmem:[%s503_s1 + $0x68] sm:$0xff] }
   0x6   :  { %301 = vmatprep.subr.bf16.mxu0 %v300_v5  ;;  %329 = vmatprep.subr.bf16.mxu1 %v300_v5  ;;  %v312_v16 = vpack.c.bf16 %v36_v15, %v35_v14  ;;  %v316_v19 = vpack.c.bf16 %v38_v18, %v37_v17  ;;  %v39_v20 = vld [vmem:[%s503_s1 + $0x60] sm:$0xff]  ;;  %v41_v23 = vld [vmem:[%s503_s1 + $0x70] sm:$0xff]  ;;  %v42_v24 = vld [vmem:[%s503_s1 + $0x78] sm:$0xff] }
   0x7   :  { %272 = vmatprep.mubr.f32.mxu0 %v11_v9  ;;  %284 = vmatprep.mubr.f32.mxu1 %v19_v10  ;;  %v320_v22 = vpack.c.bf16 %v40_v21, %v39_v20  ;;  %v324_v25 = vpack.c.bf16 %v42_v24, %v41_v23  ;;  %v12_v26 = vld [vmem:[%s504_s0 + $0x8] sm:$0xff]  ;;  %v13_v28 = vld [vmem:[%s504_s0 + $0x10] sm:$0xff]  ;;  %v14_v30 = vld [vmem:[%s504_s0 + $0x18] sm:$0xff] }
   0x8   :  { %v20_v27 = vld [vmem:[%s504_s0 + $0x48] sm:$0xff]  ;;  %v21_v29 = vld [vmem:[%s504_s0 + $0x50] sm:$0xff]  ;;  %v22_v31 = vld [vmem:[%s504_s0 + $0x58] sm:$0xff] }
   0x9   :  { %303 = vmatpush3.bf16.msra.mxu0 %v300_v5  ;;  %337 = vmatpush3.bf16.msra.mxu1 %v300_v5  ;;  %v15_v32 = vld [vmem:[%s504_s0 + $0x20] sm:$0xff]  ;;  %v16_v34 = vld [vmem:[%s504_s0 + $0x28] sm:$0xff]  ;;  %v17_v36 = vld [vmem:[%s504_s0 + $0x30] sm:$0xff] }
   0xa   :  { %305 = vmatprep.subr.bf16.mxu0 %v304_v8  ;;  %330 = vmatprep.subr.bf16.mxu1 %v304_v8  ;;  %v23_v33 = vld [vmem:[%s504_s0 + $0x60] sm:$0xff]  ;;  %v24_v35 = vld [vmem:[%s504_s0 + $0x68] sm:$0xff]  ;;  %v25_v37 = vld [vmem:[%s504_s0 + $0x70] sm:$0xff] }
   0xb   :  { %v18_v38 = vld [vmem:[%s504_s0 + $0x38] sm:$0xff] }
   0xc   :  { %v26_v39 = vld [vmem:[%s504_s0 + $0x78] sm:$0xff] }
   0xd   :  { %307 = vmatpush3.bf16.msra.mxu0 %v304_v8  ;;  %338 = vmatpush3.bf16.msra.mxu1 %v304_v8 }
   0xe   :  { %309 = vmatprep.subr.bf16.mxu0 %v308_v13  ;;  %331 = vmatprep.subr.bf16.mxu1 %v308_v13 }
  0x11   :  { %311 = vmatpush3.bf16.msra.mxu0 %v308_v13  ;;  %339 = vmatpush3.bf16.msra.mxu1 %v308_v13 }
  0x12   :  { %313 = vmatprep.subr.bf16.mxu0 %v312_v16  ;;  %332 = vmatprep.subr.bf16.mxu1 %v312_v16 }
  0x15   :  { %315 = vmatpush3.bf16.msra.mxu0 %v312_v16  ;;  %340 = vmatpush3.bf16.msra.mxu1 %v312_v16 }
  0x16   :  { %317 = vmatprep.subr.bf16.mxu0 %v316_v19  ;;  %333 = vmatprep.subr.bf16.mxu1 %v316_v19 }
  0x19   :  { %319 = vmatpush3.bf16.msra.mxu0 %v316_v19  ;;  %341 = vmatpush3.bf16.msra.mxu1 %v316_v19 }
  0x1a   :  { %321 = vmatprep.subr.bf16.mxu0 %v320_v22  ;;  %334 = vmatprep.subr.bf16.mxu1 %v320_v22 }
  0x1d   :  { %323 = vmatpush3.bf16.msra.mxu0 %v320_v22  ;;  %342 = vmatpush3.bf16.msra.mxu1 %v320_v22 }
  0x1e   :  { %325 = vmatprep.subr.bf16.mxu0 %v324_v25  ;;  %335 = vmatprep.subr.bf16.mxu1 %v324_v25 }
  0x21   :  { %327 = vmatpush3.bf16.msra.mxu0 %v324_v25  ;;  %343 = vmatpush3.bf16.msra.mxu1 %v324_v25 }
  0x24   :  { %273 = vmatmul.mubr.f32.vlgmr.msra.gmra.mrb[0].mxu0 %v12_v26  ;;  %285 = vmatmul.mubr.f32.vlgmr.msra.gmra.mrb[0].mxu1 %v20_v27 }
  0x25   :  { %275 = vmatprep.mubr.f32.mxu0 %v13_v28  ;;  %287 = vmatprep.mubr.f32.mxu1 %v21_v29 }
  0x28   :  { %276 = vmatmul.mubr.f32.gmra.mrb[2].mxu0 %v14_v30  ;;  %288 = vmatmul.mubr.f32.gmra.mrb[2].mxu1 %v22_v31 }
  0x29   :  { %278 = vmatprep.mubr.f32.mxu0 %v15_v32  ;;  %290 = vmatprep.mubr.f32.mxu1 %v23_v33 }
  0x2c   :  { %279 = vmatmul.mubr.f32.gmra.mrb[4].mxu0 %v16_v34  ;;  %291 = vmatmul.mubr.f32.gmra.mrb[4].mxu1 %v24_v35 }
  0x2d   :  { %281 = vmatprep.mubr.f32.mxu0 %v17_v36  ;;  %293 = vmatprep.mubr.f32.mxu1 %v25_v37 }
  0x30   :  { %282 = vmatmul.mubr.f32.gmra.mrb[6].mxu0 %v18_v38  ;;  %294 = vmatmul.mubr.f32.gmra.mrb[6].mxu1 %v26_v39 }
  0xf7   :  { %v274_v40 = vpop.f32.mrb[0].mxu0  ;;  %v286_v41 = vpop.f32.mrb[0].mxu1 }
  0xf8   :  { %189 = vst [vmem:[%s505_s2 + $0x8] sm:$0xff] %v274_v40  ;;  %197 = vst [vmem:[%s505_s2 + $0x48] sm:$0xff] %v286_v41  ;;  %v109_v42 = vpop.f32.mrb[1].mxu0  ;;  %v149_v43 = vpop.f32.mrb[1].mxu1 }
  0xf9   :  { %188 = vst [vmem:[%s505_s2] sm:$0xff] %v109_v42  ;;  %196 = vst [vmem:[%s505_s2 + $0x40] sm:$0xff] %v149_v43 }
  0xfb   :  { %v277_v44 = vpop.f32.mrb[2].mxu0  ;;  %v289_v45 = vpop.f32.mrb[2].mxu1 }
  0xfc   :  { %191 = vst [vmem:[%s505_s2 + $0x18] sm:$0xff] %v277_v44  ;;  %199 = vst [vmem:[%s505_s2 + $0x58] sm:$0xff] %v289_v45  ;;  %v119_v46 = vpop.f32.mrb[3].mxu0  ;;  %v159_v47 = vpop.f32.mrb[3].mxu1 }
  0xfd   :  { %190 = vst [vmem:[%s505_s2 + $0x10] sm:$0xff] %v119_v46  ;;  %198 = vst [vmem:[%s505_s2 + $0x50] sm:$0xff] %v159_v47 }
  0xff   :  { %v280_v48 = vpop.f32.mrb[4].mxu0  ;;  %v292_v49 = vpop.f32.mrb[4].mxu1 }
 0x100   :  { %193 = vst [vmem:[%s505_s2 + $0x28] sm:$0xff] %v280_v48  ;;  %201 = vst [vmem:[%s505_s2 + $0x68] sm:$0xff] %v292_v49  ;;  %v129_v50 = vpop.f32.mrb[5].mxu0  ;;  %v169_v51 = vpop.f32.mrb[5].mxu1 }
 0x101   :  { %192 = vst [vmem:[%s505_s2 + $0x20] sm:$0xff] %v129_v50  ;;  %200 = vst [vmem:[%s505_s2 + $0x60] sm:$0xff] %v169_v51 }
 0x103   :  { %v283_v52 = vpop.f32.mrb[6].mxu0  ;;  %v295_v53 = vpop.f32.mrb[6].mxu1 }
 0x104   :  { %195 = vst [vmem:[%s505_s2 + $0x38] sm:$0xff] %v283_v52  ;;  %203 = vst [vmem:[%s505_s2 + $0x78] sm:$0xff] %v295_v53  ;;  %v139_v54 = vpop.f32.mrb[7].mxu0  ;;  %v179_v55 = vpop.f32.mrb[7].mxu1 }
 0x105   :  { %194 = vst [vmem:[%s505_s2 + $0x30] sm:$0xff] %v139_v54  ;;  %202 = vst [vmem:[%s505_s2 + $0x70] sm:$0xff] %v179_v55 }

// kernel: gcn_forward.3
= control target key start
LH: loop header
LB: loop body
LE: loop exit
PB: predicated region body
PF: predicated region fallthrough
CT: control target
= control target key end

     0   :  { %s886_s2 = inlined_call_operand.vmem [shape: f32[128,128], index: 2, kind: input, shape index: {}]   ;;  %s887_s0 = inlined_call_operand.vmem [shape: f32[128,128], index: 0, kind: input, shape index: {}]   ;;  %s888_s1 = inlined_call_operand.vmem [shape: f32[128,128], index: 1, kind: input, shape index: {}]   ;;  %s889_s3 = inlined_call_operand.vmem [shape: f32[128,128], index: 3, kind: output, shape index: {}]  }
   0x1   :  { %v82_v0 = vld [vmem:[%s886_s2] sm:$0xff]  ;;  %v83_v1 = vld [vmem:[%s886_s2 + $0x8] sm:$0xff]  ;;  %v84_v2 = vld [vmem:[%s886_s2 + $0x10] sm:$0xff] }
   0x2   :  { %v514_v3 = vpack.c.bf16 %v83_v1, %v82_v0  ;;  %v85_v4 = vld [vmem:[%s886_s2 + $0x18] sm:$0xff]  ;;  %v86_v6 = vld [vmem:[%s886_s2 + $0x20] sm:$0xff]  ;;  %v87_v7 = vld [vmem:[%s886_s2 + $0x28] sm:$0xff] }
   0x3   :  { %v518_v5 = vpack.c.bf16 %v85_v4, %v84_v2  ;;  %v522_v8 = vpack.c.bf16 %v87_v7, %v86_v6  ;;  %v88_v9 = vld [vmem:[%s886_s2 + $0x30] sm:$0xff]  ;;  %v34_v10 = vld [vmem:[%s887_s0] sm:$0xff]  ;;  %v89_v12 = vld [vmem:[%s886_s2 + $0x38] sm:$0xff] }
   0x4   :  { %515 = vmatprep.subr.bf16.mxu0 %v514_v3  ;;  %546 = vmatprep.subr.bf16.mxu1 %v514_v3  ;;  %v50_v11 = vld [vmem:[%s888_s1] sm:$0xff]  ;;  %v526_v17 = vpack.c.bf16 %v89_v12, %v88_v9  ;;  %v91_v19 = vld [vmem:[%s886_s2 + $0x48] sm:$0xff]  ;;  %v92_v21 = vld [vmem:[%s886_s2 + $0x50] sm:$0xff] }
   0x5   :  { %517 = vmatpush3.bf16.msra.mxu0 %v514_v3  ;;  %554 = vmatpush3.bf16.msra.mxu1 %v514_v3  ;;  %v66_v13 = vadd.f32 %v50_v11, %v34_v10  ;;  %v42_v14 = vld [vmem:[%s887_s0 + $0x40] sm:$0xff]  ;;  %v93_v22 = vld [vmem:[%s886_s2 + $0x58] sm:$0xff]  ;;  %v95_v25 = vld [vmem:[%s886_s2 + $0x68] sm:$0xff] }
   0x6   :  { %519 = vmatprep.subr.bf16.mxu0 %v518_v5  ;;  %547 = vmatprep.subr.bf16.mxu1 %v518_v5  ;;  %v58_v15 = vld [vmem:[%s888_s1 + $0x40] sm:$0xff]  ;;  %v534_v23 = vpack.c.bf16 %v93_v22, %v92_v21  ;;  %v96_v27 = vld [vmem:[%s886_s2 + $0x70] sm:$0xff]  ;;  %v97_v28 = vld [vmem:[%s886_s2 + $0x78] sm:$0xff] }
   0x7   :  { %v74_v16 = vadd.f32 %v58_v15, %v42_v14  ;;  %v90_v18 = vld [vmem:[%s886_s2 + $0x40] sm:$0xff]  ;;  %490 = vmatprep.mubr.f32.mxu0 %v66_v13  ;;  %v542_v29 = vpack.c.bf16 %v97_v28, %v96_v27  ;;  %v35_v30 = vld [vmem:[%s887_s0 + $0x8] sm:$0xff]  ;;  %v36_v34 = vld [vmem:[%s887_s0 + $0x10] sm:$0xff] }
   0x8   :  { %v530_v20 = vpack.c.bf16 %v91_v19, %v90_v18  ;;  %v94_v24 = vld [vmem:[%s886_s2 + $0x60] sm:$0xff]  ;;  %v51_v31 = vld [vmem:[%s888_s1 + $0x8] sm:$0xff]  ;;  %v52_v35 = vld [vmem:[%s888_s1 + $0x10] sm:$0xff] }
   0x9   :  { %521 = vmatpush3.bf16.msra.mxu0 %v518_v5  ;;  %555 = vmatpush3.bf16.msra.mxu1 %v518_v5  ;;  %v538_v26 = vpack.c.bf16 %v95_v25, %v94_v24  ;;  %v43_v32 = vld [vmem:[%s887_s0 + $0x48] sm:$0xff]  ;;  %v44_v36 = vld [vmem:[%s887_s0 + $0x50] sm:$0xff]  ;;  %v67_v38 = vadd.f32 %v51_v31, %v35_v30  ;;  %v37_v40 = vld [vmem:[%s887_s0 + $0x18] sm:$0xff]  ;;  %v68_v42 = vadd.f32 %v52_v35, %v36_v34 }
   0xa   :  { %523 = vmatprep.subr.bf16.mxu0 %v522_v8  ;;  %548 = vmatprep.subr.bf16.mxu1 %v522_v8  ;;  %v59_v33 = vld [vmem:[%s888_s1 + $0x48] sm:$0xff]  ;;  %v60_v37 = vld [vmem:[%s888_s1 + $0x50] sm:$0xff]  ;;  %v53_v41 = vld [vmem:[%s888_s1 + $0x18] sm:$0xff] }
   0xb   :  { %502 = vmatprep.mubr.f32.mxu1 %v74_v16  ;;  %v75_v39 = vadd.f32 %v59_v33, %v43_v32  ;;  %v76_v43 = vadd.f32 %v60_v37, %v44_v36  ;;  %v45_v44 = vld [vmem:[%s887_s0 + $0x58] sm:$0xff]  ;;  %v38_v46 = vld [vmem:[%s887_s0 + $0x20] sm:$0xff]  ;;  %v69_v50 = vadd.f32 %v53_v41, %v37_v40  ;;  %v39_v52 = vld [vmem:[%s887_s0 + $0x28] sm:$0xff] }
   0xc   :  { %v61_v45 = vld [vmem:[%s888_s1 + $0x58] sm:$0xff]  ;;  %v54_v47 = vld [vmem:[%s888_s1 + $0x20] sm:$0xff]  ;;  %v55_v53 = vld [vmem:[%s888_s1 + $0x28] sm:$0xff] }
   0xd   :  { %525 = vmatpush3.bf16.msra.mxu0 %v522_v8  ;;  %556 = vmatpush3.bf16.msra.mxu1 %v522_v8  ;;  %v46_v48 = vld [vmem:[%s887_s0 + $0x60] sm:$0xff]  ;;  %v77_v51 = vadd.f32 %v61_v45, %v45_v44  ;;  %v70_v54 = vadd.f32 %v54_v47, %v38_v46  ;;  %v47_v56 = vld [vmem:[%s887_s0 + $0x68] sm:$0xff]  ;;  %v40_v58 = vld [vmem:[%s887_s0 + $0x30] sm:$0xff]  ;;  %v71_v62 = vadd.f32 %v55_v53, %v39_v52 }
   0xe   :  { %527 = vmatprep.subr.bf16.mxu0 %v526_v17  ;;  %549 = vmatprep.subr.bf16.mxu1 %v526_v17  ;;  %v62_v49 = vld [vmem:[%s888_s1 + $0x60] sm:$0xff]  ;;  %v63_v57 = vld [vmem:[%s888_s1 + $0x68] sm:$0xff]  ;;  %v56_v59 = vld [vmem:[%s888_s1 + $0x30] sm:$0xff] }
   0xf   :  { %v78_v55 = vadd.f32 %v62_v49, %v46_v48  ;;  %v48_v60 = vld [vmem:[%s887_s0 + $0x70] sm:$0xff]  ;;  %v79_v63 = vadd.f32 %v63_v57, %v47_v56  ;;  %v41_v0 = vld [vmem:[%s887_s0 + $0x38] sm:$0xff]  ;;  %v72_v1 = vadd.f32 %v56_v59, %v40_v58 }
  0x10   :  { %v64_v61 = vld [vmem:[%s888_s1 + $0x70] sm:$0xff]  ;;  %v57_v2 = vld [vmem:[%s888_s1 + $0x38] sm:$0xff] }
  0x11   :  { %529 = vmatpush3.bf16.msra.mxu0 %v526_v17  ;;  %557 = vmatpush3.bf16.msra.mxu1 %v526_v17  ;;  %v80_v3 = vadd.f32 %v64_v61, %v48_v60  ;;  %v49_v4 = vld [vmem:[%s887_s0 + $0x78] sm:$0xff]  ;;  %v73_v6 = vadd.f32 %v57_v2, %v41_v0 }
  0x12   :  { %531 = vmatprep.subr.bf16.mxu0 %v530_v20  ;;  %550 = vmatprep.subr.bf16.mxu1 %v530_v20  ;;  %v65_v5 = vld [vmem:[%s888_s1 + $0x78] sm:$0xff] }
  0x13   :  { %v81_v7 = vadd.f32 %v65_v5, %v49_v4 }
  0x15   :  { %533 = vmatpush3.bf16.msra.mxu0 %v530_v20  ;;  %558 = vmatpush3.bf16.msra.mxu1 %v530_v20 }
  0x16   :  { %535 = vmatprep.subr.bf16.mxu0 %v534_v23  ;;  %551 = vmatprep.subr.bf16.mxu1 %v534_v23 }
  0x19   :  { %537 = vmatpush3.bf16.msra.mxu0 %v534_v23  ;;  %559 = vmatpush3.bf16.msra.mxu1 %v534_v23 }
  0x1a   :  { %539 = vmatprep.subr.bf16.mxu0 %v538_v26  ;;  %552 = vmatprep.subr.bf16.mxu1 %v538_v26 }
  0x1d   :  { %541 = vmatpush3.bf16.msra.mxu0 %v538_v26  ;;  %560 = vmatpush3.bf16.msra.mxu1 %v538_v26 }
  0x1e   :  { %543 = vmatprep.subr.bf16.mxu0 %v542_v29  ;;  %553 = vmatprep.subr.bf16.mxu1 %v542_v29 }
  0x21   :  { %545 = vmatpush3.bf16.msra.mxu0 %v542_v29  ;;  %561 = vmatpush3.bf16.msra.mxu1 %v542_v29 }
  0x24   :  { %491 = vmatmul.mubr.f32.vlgmr.msra.gmra.mrb[0].mxu0 %v67_v38  ;;  %503 = vmatmul.mubr.f32.vlgmr.msra.gmra.mrb[0].mxu1 %v75_v39 }
  0x25   :  { %493 = vmatprep.mubr.f32.mxu0 %v68_v42  ;;  %505 = vmatprep.mubr.f32.mxu1 %v76_v43 }
  0x28   :  { %494 = vmatmul.mubr.f32.gmra.mrb[2].mxu0 %v69_v50  ;;  %506 = vmatmul.mubr.f32.gmra.mrb[2].mxu1 %v77_v51 }
  0x29   :  { %496 = vmatprep.mubr.f32.mxu0 %v70_v54  ;;  %508 = vmatprep.mubr.f32.mxu1 %v78_v55 }
  0x2c   :  { %497 = vmatmul.mubr.f32.gmra.mrb[4].mxu0 %v71_v62  ;;  %509 = vmatmul.mubr.f32.gmra.mrb[4].mxu1 %v79_v63 }
  0x2d   :  { %499 = vmatprep.mubr.f32.mxu0 %v72_v1  ;;  %511 = vmatprep.mubr.f32.mxu1 %v80_v3 }
  0x30   :  { %500 = vmatmul.mubr.f32.gmra.mrb[6].mxu0 %v73_v6  ;;  %512 = vmatmul.mubr.f32.gmra.mrb[6].mxu1 %v81_v7 }
  0xf7   :  { %v758_v8 = vpop.f32.mrb[0].mxu0  ;;  %v760_v9 = vpop.f32.mrb[0].mxu1 }
  0xf8   :  { %v762_v10 = vpop.f32.mrb[1].mxu0  ;;  %v764_v11 = vpop.f32.mrb[1].mxu1  ;;  %v319_v12 = vmul.f32 %v760_v9, %v760_v9  ;;  %v311_v13 = vmul.f32 %v758_v8, %v758_v8 }
  0xf9   :  { %v310_v17 = vmul.f32 %v762_v10, %v762_v10  ;;  %v318_v23 = vmul.f32 %v764_v11, %v764_v11 }
  0xfa   :  { %344 = vadd.xlane.f32.xlu1 %v319_v12  ;;  %328 = vadd.xlane.f32.xlu0 %v311_v13 }
  0xfb   :  { %v770_v14 = vpop.f32.mrb[2].mxu0  ;;  %v772_v15 = vpop.f32.mrb[2].mxu1 }
  0xfc   :  { %v774_v16 = vpop.f32.mrb[3].mxu0  ;;  %v313_v18 = vmul.f32 %v770_v14, %v770_v14  ;;  %v780_v19 = vpop.f32.mrb[3].mxu1  ;;  %v321_v20 = vmul.f32 %v772_v15, %v772_v15 }
  0xfd   :  { %v320_v28 = vmul.f32 %v780_v19, %v780_v19  ;;  %v312_v29 = vmul.f32 %v774_v16, %v774_v16 }
  0xfe   :  { %326 = vadd.xlane.f32.xlu0 %v310_v17  ;;  %332 = vadd.xlane.f32.xlu1 %v313_v18 }
  0xff   :  { %v784_v21 = vpop.f32.mrb[4].mxu0  ;;  %v786_v22 = vpop.f32.mrb[4].mxu1 }
 0x100   :  { %v790_v24 = vpop.f32.mrb[5].mxu0  ;;  %v792_v25 = vpop.f32.mrb[5].mxu1  ;;  %v315_v32 = vmul.f32 %v784_v21, %v784_v21  ;;  %v323_v34 = vmul.f32 %v786_v22, %v786_v22 }
 0x101   :  { %v314_v33 = vmul.f32 %v790_v24, %v790_v24  ;;  %v322_v35 = vmul.f32 %v792_v25, %v792_v25 }
 0x102   :  { %342 = vadd.xlane.f32.xlu0 %v318_v23  ;;  %348 = vadd.xlane.f32.xlu1 %v321_v20 }
 0x103   :  { %v794_v26 = vpop.f32.mrb[6].mxu0  ;;  %v796_v27 = vpop.f32.mrb[6].mxu1 }
 0x104   :  { %v802_v30 = vpop.f32.mrb[7].mxu0  ;;  %v804_v31 = vpop.f32.mrb[7].mxu1  ;;  %v317_v37 = vmul.f32 %v794_v26, %v794_v26  ;;  %v325_v39 = vmul.f32 %v796_v27, %v796_v27 }
 0x105   :  { %v316_v36 = vmul.f32 %v802_v30, %v802_v30  ;;  %v324_v38 = vmul.f32 %v804_v31, %v804_v31 }
 0x106   :  { %346 = vadd.xlane.f32.xlu0 %v320_v28  ;;  %330 = vadd.xlane.f32.xlu1 %v312_v29 }
 0x10a   :  { %336 = vadd.xlane.f32.xlu1 %v315_v32  ;;  %334 = vadd.xlane.f32.xlu0 %v314_v33 }
 0x10e   :  { %352 = vadd.xlane.f32.xlu1 %v323_v34  ;;  %350 = vadd.xlane.f32.xlu0 %v322_v35 }
 0x112   :  { %340 = vadd.xlane.f32.xlu1 %v317_v37  ;;  %338 = vadd.xlane.f32.xlu0 %v316_v36 }
 0x116   :  { %356 = vadd.xlane.f32.xlu1 %v325_v39  ;;  %354 = vadd.xlane.f32.xlu0 %v324_v38 }
 0x187   :  { %v345_v40 = vpop.xlane.xlu1 %344  ;;  %v329_v41 = vpop.xlane.xlu0 %328 }
 0x188   :  { %v367_v42 = vmax.f32 %v345_v40, 1e-24  ;;  %v359_v43 = vmax.f32 %v329_v41, 1e-24 }
 0x18a   :  { %562 = vrsqrt.f32 %v367_v42 }
 0x18b   :  { %564 = vrsqrt.f32 %v359_v43  ;;  %v327_v44 = vpop.xlane.xlu0 %326  ;;  %v333_v45 = vpop.xlane.xlu1 %332 }
 0x18c   :  { %v358_v46 = vmax.f32 %v327_v44, 1e-24  ;;  %v361_v47 = vmax.f32 %v333_v45, 1e-24 }
 0x18e   :  { %566 = vrsqrt.f32 %v358_v46 }
 0x18f   :  { %568 = vrsqrt.f32 %v361_v47  ;;  %v343_v48 = vpop.xlane.xlu0 %342  ;;  %v349_v49 = vpop.xlane.xlu1 %348 }
 0x190   :  { %v366_v50 = vmax.f32 %v343_v48, 1e-24  ;;  %v369_v51 = vmax.f32 %v349_v49, 1e-24 }
 0x192   :  { %570 = vrsqrt.f32 %v366_v50 }
 0x193   :  { %572 = vrsqrt.f32 %v369_v51  ;;  %v347_v52 = vpop.xlane.xlu0 %346  ;;  %v331_v53 = vpop.xlane.xlu1 %330 }
 0x194   :  { %v563_v54 = vpop.eup %562  ;;  %v368_v55 = vmax.f32 %v347_v52, 1e-24  ;;  %v360_v56 = vmax.f32 %v331_v53, 1e-24 }
 0x195   :  { %v565_v57 = vpop.eup %564  ;;  %v399_v58 = vmul.f32 %v563_v54, %v760_v9 }
 0x196   :  { %v391_v59 = vmul.f32 %v565_v57, %v758_v8  ;;  %574 = vrsqrt.f32 %v368_v55 }
 0x197   :  { %415 = vst [vmem:[%s889_s3 + $0x48] sm:$0xff] %v399_v58  ;;  %576 = vrsqrt.f32 %v360_v56  ;;  %v337_v60 = vpop.xlane.xlu1 %336  ;;  %v335_v61 = vpop.xlane.xlu0 %334 }
 0x198   :  { %v567_v62 = vpop.eup %566  ;;  %407 = vst [vmem:[%s889_s3 + $0x8] sm:$0xff] %v391_v59  ;;  %v363_v63 = vmax.f32 %v337_v60, 1e-24  ;;  %v362_v0 = vmax.f32 %v335_v61, 1e-24 }
 0x199   :  { %v569_v1 = vpop.eup %568  ;;  %v390_v2 = vmul.f32 %v567_v62, %v762_v10 }
 0x19a   :  { %v393_v3 = vmul.f32 %v569_v1, %v770_v14  ;;  %578 = vrsqrt.f32 %v363_v63 }
 0x19b   :  { %406 = vst [vmem:[%s889_s3] sm:$0xff] %v390_v2  ;;  %580 = vrsqrt.f32 %v362_v0  ;;  %v353_v4 = vpop.xlane.xlu1 %352  ;;  %v351_v5 = vpop.xlane.xlu0 %350 }
 0x19c   :  { %v571_v6 = vpop.eup %570  ;;  %409 = vst [vmem:[%s889_s3 + $0x18] sm:$0xff] %v393_v3  ;;  %v371_v7 = vmax.f32 %v353_v4, 1e-24  ;;  %v370_v8 = vmax.f32 %v351_v5, 1e-24 }
 0x19d   :  { %v573_v9 = vpop.eup %572  ;;  %v398_v10 = vmul.f32 %v571_v6, %v764_v11 }
 0x19e   :  { %v401_v12 = vmul.f32 %v573_v9, %v772_v15  ;;  %582 = vrsqrt.f32 %v371_v7 }
 0x19f   :  { %414 = vst [vmem:[%s889_s3 + $0x40] sm:$0xff] %v398_v10  ;;  %584 = vrsqrt.f32 %v370_v8  ;;  %v341_v13 = vpop.xlane.xlu1 %340  ;;  %v339_v14 = vpop.xlane.xlu0 %338 }
 0x1a0   :  { %v575_v17 = vpop.eup %574  ;;  %417 = vst [vmem:[%s889_s3 + $0x58] sm:$0xff] %v401_v12  ;;  %v365_v18 = vmax.f32 %v341_v13, 1e-24  ;;  %v364_v20 = vmax.f32 %v339_v14, 1e-24 }
 0x1a1   :  { %v577_v23 = vpop.eup %576  ;;  %v400_v11 = vmul.f32 %v575_v17, %v780_v19 }
 0x1a2   :  { %v392_v15 = vmul.f32 %v577_v23, %v774_v16  ;;  %586 = vrsqrt.f32 %v365_v18 }
 0x1a3   :  { %416 = vst [vmem:[%s889_s3 + $0x50] sm:$0xff] %v400_v11  ;;  %588 = vrsqrt.f32 %v364_v20  ;;  %v357_v28 = vpop.xlane.xlu1 %356  ;;  %v355_v29 = vpop.xlane.xlu0 %354 }
 0x1a4   :  { %v579_v32 = vpop.eup %578  ;;  %408 = vst [vmem:[%s889_s3 + $0x10] sm:$0xff] %v392_v15  ;;  %v373_v33 = vmax.f32 %v357_v28, 1e-24  ;;  %v372_v34 = vmax.f32 %v355_v29, 1e-24 }
 0x1a5   :  { %v581_v35 = vpop.eup %580  ;;  %v395_v19 = vmul.f32 %v579_v32, %v784_v21 }
 0x1a6   :  { %v394_v16 = vmul.f32 %v581_v35, %v790_v24  ;;  %590 = vrsqrt.f32 %v373_v33 }
 0x1a7   :  { %411 = vst [vmem:[%s889_s3 + $0x28] sm:$0xff] %v395_v19  ;;  %592 = vrsqrt.f32 %v372_v34 }
 0x1a8   :  { %v583_v36 = vpop.eup %582  ;;  %410 = vst [vmem:[%s889_s3 + $0x20] sm:$0xff] %v394_v16 }
 0x1a9   :  { %v585_v37 = vpop.eup %584  ;;  %v403_v38 = vmul.f32 %v583_v36, %v786_v22 }
 0x1aa   :  { %v402_v39 = vmul.f32 %v585_v37, %v792_v25 }
 0x1ab   :  { %419 = vst [vmem:[%s889_s3 + $0x68] sm:$0xff] %v403_v38 }
 0x1ac   :  { %v587_v21 = vpop.eup %586  ;;  %418 = vst [vmem:[%s889_s3 + $0x60] sm:$0xff] %v402_v39 }
 0x1ad   :  { %v589_v24 = vpop.eup %588  ;;  %v397_v40 = vmul.f32 %v587_v21, %v794_v26 }
 0x1ae   :  { %v396_v41 = vmul.f32 %v589_v24, %v802_v30 }
 0x1af   :  { %413 = vst [vmem:[%s889_s3 + $0x38] sm:$0xff] %v397_v40 }
 0x1b0   :  { %v591_v22 = vpop.eup %590  ;;  %412 = vst [vmem:[%s889_s3 + $0x30] sm:$0xff] %v396_v41 }
 0x1b1   :  { %v593_v25 = vpop.eup %592  ;;  %v405_v42 = vmul.f32 %v591_v22, %v796_v27 }
 0x1b2   :  { %v404_v43 = vmul.f32 %v593_v25, %v804_v31 }
 0x1b3   :  { %421 = vst [vmem:[%s889_s3 + $0x78] sm:$0xff] %v405_v42 }
 0x1b4   :  { %420 = vst [vmem:[%s889_s3 + $0x70] sm:$0xff] %v404_v43 }

</bundles_post_ra>
